<compile_context>
chip_gen: v7x
topology: tpu7x:2x2x1
jax: 0.10.0
libtpu: 0.0.40
codegen_flags: <defaults>
</compile_context>

<pallas_src>
import functools

import jax
import jax.numpy as jnp
from jax.experimental import pallas as pl
from jax.experimental.pallas import tpu as pltpu


def _round_up(a, b):
    return (a + b - 1) // b * b


# ----------------------------------------------------------------------------
# Fused single-pass kernel: full T resident per N block (1 read + 1 write of x).
# ----------------------------------------------------------------------------
def _fused_kernel(x_ref, w1_ref, w2_ref, o_ref, *, t_total, n_total):
    blk = pl.program_id(0)
    tile_n = x_ref.shape[0]
    # Number of valid N rows in this (possibly ragged last) block.
    n_valid = jnp.minimum(tile_n, n_total - blk * tile_n)
    inv_t = jnp.float32(1.0 / t_total)

    def body(i, carry):
        x = x_ref[i]                                                   # (C, T)
        # Mean over T in f32 (Mosaic masks padded lanes of the full-T dim).
        y = jnp.sum(x.astype(jnp.float32), axis=-1, keepdims=True) * inv_t   # (C, 1)
        # Weights stay in torch layout: W1 (H, C), W2 (C, H) -> plain 2-D dots.
        h = jnp.maximum(
            jnp.dot(w1_ref[...], y, preferred_element_type=jnp.float32), 0.0)  # (H, 1)
        s = jax.nn.sigmoid(
            jnp.dot(w2_ref[...], h, preferred_element_type=jnp.float32))       # (C, 1)
        # Multiply in the input dtype (no full f32 copy of x); broadcast over lanes.
        o_ref[i] = x * s.astype(x.dtype)
        return carry

    jax.lax.fori_loop(0, n_valid, body, 0)


# ----------------------------------------------------------------------------
# Two-pass fallback, pass 1: pool over T + FC (Linear -> ReLU -> Linear -> Sigmoid).
# ----------------------------------------------------------------------------
def _pool_fc_kernel(x_ref, w1_ref, w2_ref, s_ref, acc_ref, *, t_total):
    k = pl.program_id(1)             # T-tile index (reduction axis, last in grid)
    num_k = pl.num_programs(1)
    tile_t = x_ref.shape[-1]

    @pl.when(k == 0)
    def _init():
        acc_ref[...] = jnp.zeros_like(acc_ref)

    x = x_ref[...].astype(jnp.float32)                        # (tile_n, C, tile_t)
    if t_total % tile_t != 0:
        # Ragged last T tile: zero the out-of-bounds lanes before summing so
        # the final mean divides by the true T, not the padded length.
        t_idx = k * tile_t + jax.lax.broadcasted_iota(jnp.int32, x.shape, 2)
        x = jnp.where(t_idx < t_total, x, 0.0)

    acc_ref[...] += jnp.sum(x, axis=-1)                       # partial sums (tile_n, C)

    @pl.when(k == num_k - 1)
    def _finalize():
        # FC runs exactly once per N block, never per T tile.
        y = acc_ref[...] * jnp.float32(1.0 / t_total)         # mean over T
        h = jnp.maximum(
            jnp.dot(y, w1_ref[...], preferred_element_type=jnp.float32), 0.0)
        s = jnp.dot(h, w2_ref[...], preferred_element_type=jnp.float32)
        s_ref[...] = jax.nn.sigmoid(s).astype(s_ref.dtype)    # (tile_n, C)


# ----------------------------------------------------------------------------
# Two-pass fallback, pass 2: out = x * s, x streamed as a lane-dense (N*C, T) slab.
# ----------------------------------------------------------------------------
def _scale_kernel(x_ref, s_ref, o_ref):
    o_ref[...] = x_ref[...] * s_ref[...].astype(x_ref.dtype)  # broadcast over lanes


def _vmem_limit_bytes(*buffer_bytes):
    # Double-buffered pipelined operands + headroom; clamp to stay well under
    # v7x's 64 MiB physical VMEM while never going below a safe 16 MiB floor.
    need = sum(2 * int(b) for b in buffer_bytes) + (4 << 20)
    return int(min(max(need, 16 << 20), 48 << 20))


def se_attention(x, w1, w2, *, max_block_bytes=4 << 20):
    """x: (N, C, T); w1: (H, C) torch Linear layout; w2: (C, H) torch Linear layout."""
    n, c, t = x.shape
    hid = w1.shape[0]
    itemsize = jnp.dtype(x.dtype).itemsize

    # Padded VMEM footprint of one (1, C, T) slice (sublane/lane tiling).
    sublane = 8 * max(1, 4 // itemsize)
    slice_bytes = _round_up(c, sublane) * _round_up(t, 128) * itemsize

    # ---------------- fused single-pass plan ---------------------------------
    if slice_bytes <= max_block_bytes:
        tile_n = int(min(n, max(1, max_block_bytes // slice_bytes)))
        block_bytes = tile_n * slice_bytes
        return pl.pallas_call(
            functools.partial(_fused_kernel, t_total=t, n_total=n),
            out_shape=jax.ShapeDtypeStruct((n, c, t), x.dtype),
            grid_spec=pltpu.PrefetchScalarGridSpec(
                num_scalar_prefetch=0,
                grid=(pl.cdiv(n, tile_n),),
                in_specs=[
                    pl.BlockSpec((tile_n, c, t), lambda i: (i, 0, 0)),
                    pl.BlockSpec((hid, c), lambda i: (0, 0)),   # W1 (H, C)
                    pl.BlockSpec((c, hid), lambda i: (0, 0)),   # W2 (C, H)
                ],
                out_specs=pl.BlockSpec((tile_n, c, t), lambda i: (i, 0, 0)),
            ),
            compiler_params=pltpu.CompilerParams(
                dimension_semantics=("parallel",),
                vmem_limit_bytes=_vmem_limit_bytes(
                    block_bytes, block_bytes, hid * c * 4, c * hid * 4),
            ),
        )(x, w1, w2)

    # ---------------- two-pass plan (very long T only) ------------------------
    # Pre-transpose weights to (in, out) so pass-1 does plain row-major GEMMs.
    w1_t = jnp.asarray(w1).T                                   # (C, H)
    w2_t = jnp.asarray(w2).T                                   # (H, C)

    # T tile (lanes): full T when small, otherwise 2048 (multiple of 128).
    tile_t = t if t <= 2048 else 2048

    # Pass-1 N tile: keep the (tile_n, C, tile_t) x block around the budget.
    budget_elems = max(1, max_block_bytes // itemsize)
    max_n = max(1, budget_elems // max(1, c * tile_t))
    tile_n = int(min(n, max_n))

    # Pass-2 row tile over R = N*C rows (multiple of 8 sublanes, or full R).
    r = n * c
    max_r = max(1, budget_elems // tile_t)
    if r <= max_r:
        tile_r = r
    else:
        tile_r = max(8, (max_r // 8) * 8)
        if tile_r > r:
            tile_r = r

    # ---- pass 1: pooled mean + FC -> per-(N, C) scale s ---------------------
    s = pl.pallas_call(
        functools.partial(_pool_fc_kernel, t_total=t),
        out_shape=jax.ShapeDtypeStruct((n, c), jnp.float32),
        grid_spec=pltpu.PrefetchScalarGridSpec(
            num_scalar_prefetch=0,
            grid=(pl.cdiv(n, tile_n), pl.cdiv(t, tile_t)),
            in_specs=[
                pl.BlockSpec((tile_n, c, tile_t), lambda i, k: (i, 0, k)),
                pl.BlockSpec((c, hid), lambda i, k: (0, 0)),
                pl.BlockSpec((hid, c), lambda i, k: (0, 0)),
            ],
            out_specs=pl.BlockSpec((tile_n, c), lambda i, k: (i, 0)),
            scratch_shapes=[pltpu.VMEM((tile_n, c), jnp.float32)],
        ),
        compiler_params=pltpu.CompilerParams(
            dimension_semantics=("parallel", "arbitrary"),
            vmem_limit_bytes=_vmem_limit_bytes(
                tile_n * c * tile_t * itemsize,
                c * hid * 4, hid * c * 4, tile_n * c * 4),
        ),
    )(x, w1_t, w2_t)

    # ---- pass 2: stream x as a lane-dense (N*C, T) slab and rescale ---------
    x2 = x.reshape(r, t)               # contiguous -> metadata-only reshape
    s2 = s.reshape(r, 1)               # per-row scale, broadcast over T lanes
    out2 = pl.pallas_call(
        _scale_kernel,
        out_shape=jax.ShapeDtypeStruct((r, t), x.dtype),
        grid_spec=pltpu.PrefetchScalarGridSpec(
            num_scalar_prefetch=0,
            grid=(pl.cdiv(r, tile_r), pl.cdiv(t, tile_t)),
            in_specs=[
                pl.BlockSpec((tile_r, tile_t), lambda i, j: (i, j)),
                pl.BlockSpec((tile_r, 1), lambda i, j: (i, 0)),
            ],
            out_specs=pl.BlockSpec((tile_r, tile_t), lambda i, j: (i, j)),
        ),
        compiler_params=pltpu.CompilerParams(
            dimension_semantics=("parallel", "parallel"),
            vmem_limit_bytes=_vmem_limit_bytes(
                tile_r * tile_t * itemsize,
                tile_r * 4,
                tile_r * tile_t * itemsize),
        ),
    )(x2, s2)

    return out2.reshape(n, c, t)


def se_attention_ref(x, w1, w2):
    """Pure-JAX reference matching the PyTorch forward exactly."""
    y = jnp.mean(x, axis=-1)                      # (N, C)
    h = jnp.maximum(y @ w1.T, 0.0)                # (N, H)
    s = jax.nn.sigmoid(h @ w2.T)                  # (N, C)
    return x * s[:, :, None]


if __name__ == "__main__":
    # Small shapes consistent with the module's forward (x: NCT).
    N, C, T = 2, 4, 16
    H = 8  # hidden_dim

    key = jax.random.PRNGKey(0)
    kx, k1, k2 = jax.random.split(key, 3)

    x = jax.random.normal(kx, (N, C, T), dtype=jnp.float32)
    # torch Linear weight layout: (out_features, in_features); init_weights std=0.001.
    w1 = 0.001 * jax.random.normal(k1, (H, C), dtype=jnp.float32)  # Linear(C -> H)
    w2 = 0.001 * jax.random.normal(k2, (C, H), dtype=jnp.float32)  # Linear(H -> C)

    out = jax.block_until_ready(se_attention(x, w1, w2))
    ref = se_attention_ref(x, w1, w2)
    assert out.shape == (N, C, T)
    assert jnp.allclose(out, ref, atol=1e-5, rtol=1e-5), "mismatch vs reference (small)"

    # Second (still small) check: longer, non-128-multiple T.  Run the fused
    # single-pass path and then force the two-pass streaming path so both code
    # paths (incl. ragged-last-T-tile masking) stay covered.
    N2, C2, T2, H2 = 2, 8, 4224, 32
    kx2, k3, k4 = jax.random.split(jax.random.PRNGKey(0), 3)
    x_b = jax.random.normal(kx2, (N2, C2, T2), dtype=jnp.float32)
    w1_b = 0.001 * jax.random.normal(k3, (H2, C2), dtype=jnp.float32)
    w2_b = 0.001 * jax.random.normal(k4, (C2, H2), dtype=jnp.float32)
    ref_b = se_attention_ref(x_b, w1_b, w2_b)

    out_fused = jax.block_until_ready(se_attention(x_b, w1_b, w2_b))
    assert jnp.allclose(out_fused, ref_b, atol=1e-5, rtol=1e-5), "mismatch (fused path)"

    out_two = jax.block_until_ready(
        se_attention(x_b, w1_b, w2_b, max_block_bytes=1 << 16))
    assert jnp.allclose(out_two, ref_b, atol=1e-5, rtol=1e-5), "mismatch (two-pass path)"

    print("KERNEL_OK")
</pallas_src>

<mosaic_0001>
module attributes {stable_mosaic.version = 11 : i64} {
  func.func @_fused_kernel(%arg0: i32, %arg1: memref<2x4x16xf32, #tpu.memory_space<vmem>>, %arg2: memref<8x4xf32, #tpu.memory_space<vmem>>, %arg3: memref<4x8xf32, #tpu.memory_space<vmem>>, %arg4: memref<2x4x16xf32, #tpu.memory_space<vmem>>) attributes {dimension_semantics = [#tpu.dimension_semantics<parallel>], iteration_bounds = array<i64: 1>, scalar_prefetch = 0 : i64, scratch_operands = 0 : i64, tpu.core_type = #tpu.core_type<tc>, window_params = [{transform_indices = @transform_0, window_bounds = array<i64: 2, 4, 16>}, {pipeline_mode = #tpu.pipeline_mode<synchronous>, transform_indices = @transform_1, window_bounds = array<i64: 8, 4>}, {pipeline_mode = #tpu.pipeline_mode<synchronous>, transform_indices = @transform_2, window_bounds = array<i64: 4, 8>}, {transform_indices = @transform_3, window_bounds = array<i64: 2, 4, 16>}]} {
    %c2_i32 = arith.constant 2 : i32
    %0 = arith.muli %arg0, %c2_i32 : i32
    %c2_i32_0 = arith.constant 2 : i32
    %1 = arith.subi %c2_i32_0, %0 : i32
    %c2_i32_1 = arith.constant 2 : i32
    %2 = arith.minsi %c2_i32_1, %1 : i32
    %c0_i32 = arith.constant 0 : i32
    %cst = arith.constant 6.250000e-02 : f32
    %c0_i32_2 = arith.constant 0 : i32
    %3 = arith.subi %2, %c0_i32_2 : i32
    %4 = arith.addi %c0_i32_2, %3 : i32
    %c1_i32 = arith.constant 1 : i32
    scf.for %arg5 = %c0_i32_2 to %4 step %c1_i32  : i32 {
      %5 = arith.index_cast %arg5 : i32 to index
      %c0 = arith.constant 0 : index
      %c0_3 = arith.constant 0 : index
      %6 = vector.load %arg1[%5, %c0, %c0_3] : memref<2x4x16xf32, #tpu.memory_space<vmem>>, vector<1x4x16xf32>
      %7 = vector.shape_cast %6 : vector<1x4x16xf32> to vector<4x16xf32>
      %cst_4 = arith.constant dense<0.000000e+00> : vector<4xf32>
      %8 = vector.multi_reduction <add>, %7, %cst_4 [1] : vector<4x16xf32> to vector<4xf32>
      %9 = vector.shape_cast %8 : vector<4xf32> to vector<4x1xf32>
      %10 = vector.broadcast %cst : f32 to vector<4x1xf32>
      %11 = arith.mulf %9, %10 : vector<4x1xf32>
      %c0_5 = arith.constant 0 : index
      %c0_6 = arith.constant 0 : index
      %12 = vector.load %arg2[%c0_5, %c0_6] : memref<8x4xf32, #tpu.memory_space<vmem>>, vector<8x4xf32>
      %cst_7 = arith.constant dense<0.000000e+00> : vector<8x1xf32>
      %13 = tpu.matmul %12, %11, %cst_7 {dimension_numbers = #tpu.dot_dimension_numbers<[1], [0], [0], [1], [0, 0, 1, 1], [], []>} : vector<8x4xf32>, vector<4x1xf32>, vector<8x1xf32> -> vector<8x1xf32>
      %cst_8 = arith.constant 0.000000e+00 : f32
      %14 = vector.broadcast %cst_8 : f32 to vector<8x1xf32>
      %15 = arith.maximumf %13, %14 : vector<8x1xf32>
      %c0_9 = arith.constant 0 : index
      %c0_10 = arith.constant 0 : index
      %16 = vector.load %arg3[%c0_9, %c0_10] : memref<4x8xf32, #tpu.memory_space<vmem>>, vector<4x8xf32>
      %cst_11 = arith.constant dense<0.000000e+00> : vector<4x1xf32>
      %17 = tpu.matmul %16, %15, %cst_11 {dimension_numbers = #tpu.dot_dimension_numbers<[1], [0], [0], [1], [0, 0, 1, 1], [], []>} : vector<4x8xf32>, vector<8x1xf32>, vector<4x1xf32> -> vector<4x1xf32>
      %18 = arith.negf %17 : vector<4x1xf32>
      %19 = math.exp %18 : vector<4x1xf32>
      %cst_12 = arith.constant 1.000000e+00 : f32
      %20 = vector.broadcast %cst_12 : f32 to vector<4x1xf32>
      %21 = arith.addf %20, %19 : vector<4x1xf32>
      %22 = arith.divf %20, %21 : vector<4x1xf32>
      %23 = vector.broadcast %22 : vector<4x1xf32> to vector<4x16xf32>
      %24 = arith.mulf %7, %23 : vector<4x16xf32>
      %25 = arith.index_cast %arg5 : i32 to index
      %c0_13 = arith.constant 0 : index
      %c0_14 = arith.constant 0 : index
      %26 = vector.load %arg4[%25, %c0_13, %c0_14] : memref<2x4x16xf32, #tpu.memory_space<vmem>>, vector<1x4x16xf32>
      %27 = vector.shape_cast %26 : vector<1x4x16xf32> to vector<4x16xf32>
      %28 = vector.shape_cast %24 : vector<4x16xf32> to vector<1x4x16xf32>
      tpu.vector_store %arg4[%25, %c0_13, %c0_14], %28 {strides = array<i32>} : memref<2x4x16xf32, #tpu.memory_space<vmem>>, vector<1x4x16xf32>,
    }
    return
  }
  func.func @transform_0(%arg0: i32) -> (i32, i32, i32) {
    %c0_i32 = arith.constant 0 : i32
    %c0_i32_0 = arith.constant 0 : i32
    %c0_i32_1 = arith.constant 0 : i32
    return %arg0, %c0_i32, %c0_i32_0 : i32, i32, i32
  }
  func.func @transform_1(%arg0: i32) -> (i32, i32) {
    %c0_i32 = arith.constant 0 : i32
    %c0_i32_0 = arith.constant 0 : i32
    %c0_i32_1 = arith.constant 0 : i32
    return %c0_i32, %c0_i32_0 : i32, i32
  }
  func.func @transform_2(%arg0: i32) -> (i32, i32) {
    %c0_i32 = arith.constant 0 : i32
    %c0_i32_0 = arith.constant 0 : i32
    %c0_i32_1 = arith.constant 0 : i32
    return %c0_i32, %c0_i32_0 : i32, i32
  }
  func.func @transform_3(%arg0: i32) -> (i32, i32, i32) {
    %c0_i32 = arith.constant 0 : i32
    %c0_i32_0 = arith.constant 0 : i32
    %c0_i32_1 = arith.constant 0 : i32
    return %arg0, %c0_i32, %c0_i32_0 : i32, i32, i32
  }
}

</mosaic_0001>

<bundles_post_ra>
// kernel: tpu_custom_call.1
= control target key start
LH: loop header
LB: loop body
LE: loop exit
PB: predicated region body
PF: predicated region fallthrough
CT: control target
= control target key end

     0   :  { %8 = vsyncpa [#allocation3], 0  ;;  %s323_s12 = smov 0   ;;  %s359_s0 = inlined_call_operand.vmem [shape: f32[2,4,16], index: 0, kind: input, shape index: {}]   ;;  %s360_s1 = inlined_call_operand.vmem [shape: f32[8,4], index: 1, kind: input, shape index: {}]   ;;  %s361_s2 = inlined_call_operand.vmem [shape: f32[4,8], index: 2, kind: input, shape index: {}]   ;;  %s362_s3 = inlined_call_operand.hbm [shape: f32[2,4,16], index: 3, kind: output, shape index: {}]  }
   0x1 LB: > { %s227_s13 = sshll.u32 %s295_s12, 2  ;;  %vm28_vm0 = vcmask 125952   ;;  %v297_v2 = vmov 0.0   ;;  %vm298_vm1 = vmmov 0   ;;  %vm38_vm2 = vcmask 1043456   ;;  %v33_v5 = vld [vmem:[%s360_s1] sm:$0xff]  ;;  %s295_s12 = sphi %s323_s12, %s22_s12  }
   0x2   : > { %s26_s16 = scalar_lea.vmem %s359_s0, %s227_s13  ;;  %236 = vmatprep.subr.mxu0 %v297_v2  ;;  %241 = vmatprep.subr.mxu1 %v297_v2  ;;  %vm34_vm3 = vcmask 31744   ;;  %v113_v9 = vld [vmem:[%s361_s2] sm:$0xf]  ;;  %vm114_vm4 = vcmask 64512   ;;  %v299_v10 = vmov 0   ;;  %s200_s21 = scalar_lea.vmem [#allocation2], %s227_s13 }
   0x3   : > { %v27_v0 = vld [vmem:[%s26_s16] sm:$0xf]  ;;  %238 = vmatprep.mubr.msk.f32.mxu0 %vm298_vm1, %v297_v2  ;;  %243 = vmatprep.mubr.msk.f32.mxu1 %vm298_vm1, %v297_v2  ;;  %s22_s12 = sadd.s32 1, %s295_s12  }
   0x4   : > { %v29_v1 = vsel %vm28_vm0, %v27_v0, 0.0  ;;  %260 = vset.pattern.permute.xlu0 %v299_v10  ;;  %p21_p0 = scmp.ge.s32.totalorder %s22_s12, 2 }
   0x5   : > { %30 = vadd.xlane.f32.xlu0 %v29_v1  ;;  %s300_s22 = smov (%p21_p0), [#allocation2]  }
   0x6   :  { %s207_s23 = sshll.u32 (%p21_p0), %s300_s22, 4  ;;  %s208_s23 = int_to_ptr.vmem [resolvable:$true] %s207_s23 }
   0x7   :  { %s265_s24 = scalar_lea.vmem (%p21_p0), %s208_s23, 128  ;;  %p270_p2 = scmp.lt.s32.totalorder (%p21_p0), %s208_s23, %s208_s23 }
   0x8   :  { %p266_p1 = scmp.ne.s32.totalorder (%p21_p0), %s208_s23, %s265_s24  ;;  %p271_p3 = scmp.lt.s32.totalorder (%p21_p0), %s265_s24, %s265_s24 }
   0xa   :  { %p272_p4 = por (%p21_p0), %p271_p3, %p270_p2 }
   0xc   :  { %p273_p5 = pnand (%p21_p0), %p272_p4, %p266_p1 }
  0x92   : > { %v31_v3 = vpop.xlane.xlu0 %30 }
  0x93   : > { %v32_v4 = vmul.f32 0.0625, %v31_v3 }
  0x95   : > { %237 = vmatpush3.msk.msra.mxu0 %vm38_vm2, %v32_v4 }
  0x96   : > { %239 = vmatmul.mubr.msk.f32.vlgmr.msra.gmra.mrb[0].mxu0 %vm34_vm3, %v33_v5 }
 0x169   : > { %v108_v6 = vpop.f32.mrb[0].mxu0 }
 0x16a   : > { %v112_v7 = vmax.f32 %v108_v6, 0.0  ;;  %v240_v8 = vpop.f32.mrb[1].mxu0 }
 0x16c   : > { %242 = vmatpush3.msra.mxu1 %v112_v7 }
 0x16d   : > { %244 = vmatmul.mubr.msk.f32.vlgmr.msra.gmra.mrb[0].mxu1 %vm114_vm4, %v113_v9 }
 0x240   : > { %v184_v11 = vpop.f32.mrb[0].mxu1 }
 0x241   : > { %v231_v12 = vmul.f32 -1.442695, %v184_v11  ;;  %v245_v13 = vpop.f32.mrb[1].mxu1 }
 0x243   : > { %261 = vpow2.f32 %v231_v12 }
 0x24d   : > { %v262_v14 = vpop.eup %261 }
 0x24e   : > { %v191_v15 = vadd.f32 1.0, %v262_v14 }
 0x250   : > { %263 = vrcp.f32 %v191_v15 }
 0x25a   : > { %v264_v16 = vpop.eup %263 }
 0x25b   : > { %196 = vperm.xlu0 %260, %v264_v16  }
 0x2d7   :  { %24 = sbr.rel (!%p21_p0) target bundleno = 1 (0x1), region = 41 }
 0x2da   : > { %v197_v17 = vpop.permute.xlu0 %196 }
 0x2db   : > { %v199_v18 = vmul.f32 %v197_v17, %v27_v0 }
 0x2dd   : > { %201 = vst.msk [vmem:[%s200_s21] sm:$0xf] %vm28_vm0, %v199_v18 }
 0x2de   :  { %276 = shalt.err (!%p273_p5)
}
 0x2df   :  { %s277_s27 = scalar_lea.hbm %s362_s3, 128 }
 0x2e0   :  { %p278_p6 = scmp.ne.s32.totalorder %s362_s3, %s277_s27  ;;  %p281_p7 = scmp.lt.u32.totalorder %s277_s27, %s362_s3 }
 0x2e2   :  { %p283_p8 = pnand %p281_p7, %p278_p6 }
 0x2e4   :  { %286 = shalt.err (!%p283_p8)
}
 0x2e5   :  { %s301_s0 = smov 64   ;;  %s302_s1 = smov 4  }
 0x2e6   :  { %213 = dma.vmem_to_hbm [thread:$0]  %s208_s23, 128, %s362_s3, [#allocation3], %s301_s0, %s301_s0, %s302_s1  }
 0x2e7   :  { %291 = dma.done.wait [#allocation3], 128  }
 0x2e8   :  { %292 = vsyncadd [#allocation3], 4294967168 }
 0x2e9   :  { %217 = vsyncpa [#allocation3], 1 }

</bundles_post_ra>
